<compile_context>
chip_gen: v7x
topology: tpu7x:2x2x1
jax: 0.10.0
libtpu: 0.0.40
codegen_flags: <defaults>
</compile_context>

<pallas_src>
import jax
import jax.numpy as jnp
from jax.experimental import pallas as pl
from jax.experimental.pallas import tpu as pltpu


NEG_BIG = -1e30  # logit for padded (nonexistent) actions -> softmax prob exactly 0


def _round_up(n, m):
    return ((n + m - 1) // m) * m


def policy_p_kernel(x_ref, w1_ref, b1_ref, w2_ref, b2_ref, w3_ref, b3_ref, o_ref):
    # x: (TB, D) in its native dtype; w1/w2: (D, D) bf16; w3: (D, A_pad) bf16
    # b1/b2: (1, D) f32; b3: (1, A_pad) f32 with -1e30 in padded lanes
    cd = w1_ref.dtype
    x = x_ref[...].astype(cd)  # cast to MXU dtype in-kernel (no extra HBM pass)

    h1 = jnp.dot(x, w1_ref[...], preferred_element_type=jnp.float32) + b1_ref[...]
    h1 = jnp.maximum(h1, 0.0)

    h2 = jnp.dot(h1.astype(cd), w2_ref[...], preferred_element_type=jnp.float32) + b2_ref[...]
    h2 = jnp.maximum(h2, 0.0)

    logits = jnp.dot(h2.astype(cd), w3_ref[...], preferred_element_type=jnp.float32) + b3_ref[...]

    # Numerically-stable softmax over the (padded) action axis, all in f32.
    m = jnp.max(logits, axis=-1, keepdims=True)
    e = jnp.exp(logits - m)
    denom = jnp.sum(e, axis=-1, keepdims=True)
    o_ref[...] = (e * pl.reciprocal(denom, approx=True)).astype(o_ref.dtype)


def prepare_params(params, compute_dtype=jnp.bfloat16):
    """One-time weight prep (hoisted out of the hot path).

    Pads the action dim 65 -> 128 (zero weight cols, -1e30 bias so padded
    logits vanish under softmax) and casts matmul operands to `compute_dtype`;
    biases stay f32. Returns (prepared_params, num_actions).
    """
    w1, b1, w2, b2, w3, b3 = params
    A = w3.shape[1]
    A_pad = _round_up(A, 128)
    w3p = jnp.pad(w3, ((0, 0), (0, A_pad - A)))
    b3p = jnp.pad(b3, ((0, 0), (0, A_pad - A)), constant_values=NEG_BIG)
    prepped = (
        w1.astype(compute_dtype), b1.astype(jnp.float32),
        w2.astype(compute_dtype), b2.astype(jnp.float32),
        w3p.astype(compute_dtype), b3p.astype(jnp.float32),
    )
    return prepped, A


def policy_p_forward(x, prepared_params, num_actions, *, tb=2048,
                     out_dtype=jnp.bfloat16, unpad=True):
    """x: (B, input_size) f32 or bf16 -> softmax probabilities.

    Returns (B, num_actions) if unpad=True (PyTorch semantics), else the
    padded lane-dense (B, A_pad) array so the consumer can fuse the slice.
    """
    w1, b1, w2, b2, w3, b3 = prepared_params
    B, D = x.shape
    A_pad = w3.shape[1]

    # Batch tiling: TB rows per grid step; weights stay VMEM-resident via
    # constant index_maps. No batch padding -- pl.cdiv grid masks the tail.
    TB = min(tb, _round_up(B, 8))
    grid = (pl.cdiv(B, TB),)

    x_item = jnp.dtype(x.dtype).itemsize
    w_item = jnp.dtype(w1.dtype).itemsize
    o_item = jnp.dtype(out_dtype).itemsize
    cost = pl.CostEstimate(
        flops=2 * B * D * (D + D + A_pad),
        transcendentals=B * A_pad,
        bytes_accessed=(B * D * x_item                      # x stream
                        + B * A_pad * o_item                # output stream
                        + (2 * D * D + D * A_pad) * w_item  # weights (resident)
                        + (2 * D + A_pad) * 4),             # biases
    )

    out = pl.pallas_call(
        policy_p_kernel,
        out_shape=jax.ShapeDtypeStruct((B, A_pad), out_dtype),
        grid_spec=pltpu.PrefetchScalarGridSpec(
            num_scalar_prefetch=0,
            grid=grid,
            in_specs=[
                pl.BlockSpec((TB, D), lambda i: (i, 0)),      # x (streamed/pipelined)
                pl.BlockSpec((D, D), lambda i: (0, 0)),       # w1 (resident)
                pl.BlockSpec((1, D), lambda i: (0, 0)),       # b1
                pl.BlockSpec((D, D), lambda i: (0, 0)),       # w2
                pl.BlockSpec((1, D), lambda i: (0, 0)),       # b2
                pl.BlockSpec((D, A_pad), lambda i: (0, 0)),   # w3 (padded to 128 lanes)
                pl.BlockSpec((1, A_pad), lambda i: (0, 0)),   # b3 (padded, -1e30 lanes)
            ],
            out_specs=pl.BlockSpec((TB, A_pad), lambda i: (i, 0)),
        ),
        compiler_params=pltpu.CompilerParams(
            dimension_semantics=("parallel",),
        ),
        cost_estimate=cost,
    )(x, w1, b1, w2, b2, w3, b3)

    if unpad:
        # NOTE: this slice is an extra HBM pass; latency-sensitive callers can
        # pass unpad=False and consume the padded lane-dense layout directly.
        return out[:, :num_actions]
    return out


def init_params(key, input_size=64, num_actions=65):
    """PyTorch nn.Linear-style init (U[-1/sqrt(fan_in), 1/sqrt(fan_in)]).

    Weights stored as (in_features, out_features); biases as (1, out_features).
    """
    keys = jax.random.split(key, 6)
    bound = 1.0 / (input_size ** 0.5)

    def u(k, shape):
        return jax.random.uniform(k, shape, jnp.float32, -bound, bound)

    w1 = u(keys[0], (input_size, input_size))
    b1 = u(keys[1], (1, input_size))
    w2 = u(keys[2], (input_size, input_size))
    b2 = u(keys[3], (1, input_size))
    w3 = u(keys[4], (input_size, num_actions))
    b3 = u(keys[5], (1, num_actions))
    return (w1, b1, w2, b2, w3, b3)


def policy_p_reference(x, params, compute_dtype=None):
    """Pure-JAX reference. If compute_dtype is given, matmul operands are cast
    to it (matching the kernel's mixed-precision scheme) with f32 accumulation."""
    w1, b1, w2, b2, w3, b3 = params
    if compute_dtype is not None:
        dot = lambda a, w: jnp.dot(a.astype(compute_dtype), w.astype(compute_dtype),
                                   preferred_element_type=jnp.float32)
    else:
        dot = lambda a, w: jnp.dot(a, w)
    h1 = jnp.maximum(dot(x, w1) + b1, 0.0)
    h2 = jnp.maximum(dot(h1, w2) + b2, 0.0)
    logits = dot(h2, w3) + b3
    return jax.nn.softmax(logits, axis=-1)


if __name__ == "__main__":
    key = jax.random.PRNGKey(0)
    k_param, k_x = jax.random.split(key)

    input_size = 64
    num_actions = 65
    batch = 8

    params = init_params(k_param, input_size, num_actions)
    x = jax.random.normal(k_x, (batch, input_size), jnp.float32)

    prepared, n_act = prepare_params(params)
    out = policy_p_forward(x, prepared, n_act)
    out = jax.block_until_ready(out)

    assert out.shape == (batch, num_actions)
    out_f32 = out.astype(jnp.float32)

    # Valid probability distributions per row (bf16 output + approx reciprocal
    # => looser tolerance than the f32-output version).
    assert jnp.allclose(jnp.sum(out_f32, axis=-1), 1.0, atol=1e-2), "rows do not sum to 1"

    # Exact-scheme check: reference using the same bf16 matmul operands.
    ref_bf16 = policy_p_reference(x, params, compute_dtype=jnp.bfloat16)
    assert jnp.allclose(out_f32, ref_bf16, atol=1e-2, rtol=0), "mismatch vs bf16 reference"

    # Sanity check against the full-f32 reference.
    ref_f32 = policy_p_reference(x, params)
    assert jnp.allclose(out_f32, ref_f32, atol=3e-2, rtol=0), "mismatch vs f32 reference"

    print("KERNEL_OK")
</pallas_src>

<mosaic_0001>
module attributes {stable_mosaic.version = 11 : i64} {
  func.func @policy_p_kernel(%arg0: i32, %arg1: memref<8x64xf32, #tpu.memory_space<vmem>>, %arg2: memref<64x64xbf16, #tpu.memory_space<vmem>>, %arg3: memref<1x64xf32, #tpu.memory_space<vmem>>, %arg4: memref<64x64xbf16, #tpu.memory_space<vmem>>, %arg5: memref<1x64xf32, #tpu.memory_space<vmem>>, %arg6: memref<64x128xbf16, #tpu.memory_space<vmem>>, %arg7: memref<1x128xf32, #tpu.memory_space<vmem>>, %arg8: memref<8x128xbf16, #tpu.memory_space<vmem>>) attributes {dimension_semantics = [#tpu.dimension_semantics<parallel>], iteration_bounds = array<i64: 1>, scalar_prefetch = 0 : i64, scratch_operands = 0 : i64, tpu.core_type = #tpu.core_type<tc>, window_params = [{transform_indices = @transform_0, window_bounds = array<i64: 8, 64>}, {pipeline_mode = #tpu.pipeline_mode<synchronous>, transform_indices = @transform_1, window_bounds = array<i64: 64, 64>}, {pipeline_mode = #tpu.pipeline_mode<synchronous>, transform_indices = @transform_2, window_bounds = array<i64: 1, 64>}, {pipeline_mode = #tpu.pipeline_mode<synchronous>, transform_indices = @transform_3, window_bounds = array<i64: 64, 64>}, {pipeline_mode = #tpu.pipeline_mode<synchronous>, transform_indices = @transform_4, window_bounds = array<i64: 1, 64>}, {pipeline_mode = #tpu.pipeline_mode<synchronous>, transform_indices = @transform_5, window_bounds = array<i64: 64, 128>}, {pipeline_mode = #tpu.pipeline_mode<synchronous>, transform_indices = @transform_6, window_bounds = array<i64: 1, 128>}, {transform_indices = @transform_7, window_bounds = array<i64: 8, 128>}]} {
    %c0 = arith.constant 0 : index
    %c0_0 = arith.constant 0 : index
    %0 = vector.load %arg1[%c0, %c0_0] : memref<8x64xf32, #tpu.memory_space<vmem>>, vector<8x64xf32>
    %1 = arith.truncf %0 : vector<8x64xf32> to vector<8x64xbf16>
    %c0_1 = arith.constant 0 : index
    %c0_2 = arith.constant 0 : index
    %2 = vector.load %arg2[%c0_1, %c0_2] : memref<64x64xbf16, #tpu.memory_space<vmem>>, vector<64x64xbf16>
    %cst = arith.constant dense<0.000000e+00> : vector<8x64xf32>
    %3 = tpu.matmul %1, %2, %cst {dimension_numbers = #tpu.dot_dimension_numbers<[1], [0], [0], [1], [0, 0, 1, 1], [], []>} : vector<8x64xbf16>, vector<64x64xbf16>, vector<8x64xf32> -> vector<8x64xf32>
    %c0_3 = arith.constant 0 : index
    %c0_4 = arith.constant 0 : index
    %4 = vector.load %arg3[%c0_3, %c0_4] : memref<1x64xf32, #tpu.memory_space<vmem>>, vector<1x64xf32>
    %5 = vector.broadcast %4 : vector<1x64xf32> to vector<8x64xf32>
    %6 = arith.addf %3, %5 : vector<8x64xf32>
    %cst_5 = arith.constant 0.000000e+00 : f32
    %7 = vector.broadcast %cst_5 : f32 to vector<8x64xf32>
    %8 = arith.maximumf %6, %7 : vector<8x64xf32>
    %9 = arith.truncf %8 : vector<8x64xf32> to vector<8x64xbf16>
    %c0_6 = arith.constant 0 : index
    %c0_7 = arith.constant 0 : index
    %10 = vector.load %arg4[%c0_6, %c0_7] : memref<64x64xbf16, #tpu.memory_space<vmem>>, vector<64x64xbf16>
    %cst_8 = arith.constant dense<0.000000e+00> : vector<8x64xf32>
    %11 = tpu.matmul %9, %10, %cst_8 {dimension_numbers = #tpu.dot_dimension_numbers<[1], [0], [0], [1], [0, 0, 1, 1], [], []>} : vector<8x64xbf16>, vector<64x64xbf16>, vector<8x64xf32> -> vector<8x64xf32>
    %c0_9 = arith.constant 0 : index
    %c0_10 = arith.constant 0 : index
    %12 = vector.load %arg5[%c0_9, %c0_10] : memref<1x64xf32, #tpu.memory_space<vmem>>, vector<1x64xf32>
    %13 = vector.broadcast %12 : vector<1x64xf32> to vector<8x64xf32>
    %14 = arith.addf %11, %13 : vector<8x64xf32>
    %cst_11 = arith.constant 0.000000e+00 : f32
    %15 = vector.broadcast %cst_11 : f32 to vector<8x64xf32>
    %16 = arith.maximumf %14, %15 : vector<8x64xf32>
    %17 = arith.truncf %16 : vector<8x64xf32> to vector<8x64xbf16>
    %c0_12 = arith.constant 0 : index
    %c0_13 = arith.constant 0 : index
    %18 = vector.load %arg6[%c0_12, %c0_13] : memref<64x128xbf16, #tpu.memory_space<vmem>>, vector<64x128xbf16>
    %cst_14 = arith.constant dense<0.000000e+00> : vector<8x128xf32>
    %19 = tpu.matmul %17, %18, %cst_14 {dimension_numbers = #tpu.dot_dimension_numbers<[1], [0], [0], [1], [0, 0, 1, 1], [], []>} : vector<8x64xbf16>, vector<64x128xbf16>, vector<8x128xf32> -> vector<8x128xf32>
    %c0_15 = arith.constant 0 : index
    %c0_16 = arith.constant 0 : index
    %20 = vector.load %arg7[%c0_15, %c0_16] : memref<1x128xf32, #tpu.memory_space<vmem>>, vector<1x128xf32>
    %21 = vector.broadcast %20 : vector<1x128xf32> to vector<8x128xf32>
    %22 = arith.addf %19, %21 : vector<8x128xf32>
    %cst_17 = arith.constant dense<0xFF800000> : vector<8xf32>
    %23 = vector.multi_reduction <maximumf>, %22, %cst_17 [1] : vector<8x128xf32> to vector<8xf32>
    %24 = vector.shape_cast %23 : vector<8xf32> to vector<8x1xf32>
    %25 = vector.broadcast %24 : vector<8x1xf32> to vector<8x128xf32>
    %26 = arith.subf %22, %25 : vector<8x128xf32>
    %27 = math.exp %26 : vector<8x128xf32>
    %cst_18 = arith.constant dense<0.000000e+00> : vector<8xf32>
    %28 = vector.multi_reduction <add>, %27, %cst_18 [1] : vector<8x128xf32> to vector<8xf32>
    %29 = vector.shape_cast %28 : vector<8xf32> to vector<8x1xf32>
    %30 = tpu.reciprocal %29 {approx = true} : vector<8x1xf32> -> vector<8x1xf32>
    %31 = vector.broadcast %30 : vector<8x1xf32> to vector<8x128xf32>
    %32 = arith.mulf %27, %31 : vector<8x128xf32>
    %33 = arith.truncf %32 : vector<8x128xf32> to vector<8x128xbf16>
    %c0_19 = arith.constant 0 : index
    %c0_20 = arith.constant 0 : index
    %34 = vector.load %arg8[%c0_19, %c0_20] : memref<8x128xbf16, #tpu.memory_space<vmem>>, vector<8x128xbf16>
    tpu.vector_store %arg8[%c0_19, %c0_20], %33 {strides = array<i32>} : memref<8x128xbf16, #tpu.memory_space<vmem>>, vector<8x128xbf16>,
    return
  }
  func.func @transform_0(%arg0: i32) -> (i32, i32) {
    %c0_i32 = arith.constant 0 : i32
    %c0_i32_0 = arith.constant 0 : i32
    return %arg0, %c0_i32 : i32, i32
  }
  func.func @transform_1(%arg0: i32) -> (i32, i32) {
    %c0_i32 = arith.constant 0 : i32
    %c0_i32_0 = arith.constant 0 : i32
    %c0_i32_1 = arith.constant 0 : i32
    return %c0_i32, %c0_i32_0 : i32, i32
  }
  func.func @transform_2(%arg0: i32) -> (i32, i32) {
    %c0_i32 = arith.constant 0 : i32
    %c0_i32_0 = arith.constant 0 : i32
    %c0_i32_1 = arith.constant 0 : i32
    return %c0_i32, %c0_i32_0 : i32, i32
  }
  func.func @transform_3(%arg0: i32) -> (i32, i32) {
    %c0_i32 = arith.constant 0 : i32
    %c0_i32_0 = arith.constant 0 : i32
    %c0_i32_1 = arith.constant 0 : i32
    return %c0_i32, %c0_i32_0 : i32, i32
  }
  func.func @transform_4(%arg0: i32) -> (i32, i32) {
    %c0_i32 = arith.constant 0 : i32
    %c0_i32_0 = arith.constant 0 : i32
    %c0_i32_1 = arith.constant 0 : i32
    return %c0_i32, %c0_i32_0 : i32, i32
  }
  func.func @transform_5(%arg0: i32) -> (i32, i32) {
    %c0_i32 = arith.constant 0 : i32
    %c0_i32_0 = arith.constant 0 : i32
    %c0_i32_1 = arith.constant 0 : i32
    return %c0_i32, %c0_i32_0 : i32, i32
  }
  func.func @transform_6(%arg0: i32) -> (i32, i32) {
    %c0_i32 = arith.constant 0 : i32
    %c0_i32_0 = arith.constant 0 : i32
    %c0_i32_1 = arith.constant 0 : i32
    return %c0_i32, %c0_i32_0 : i32, i32
  }
  func.func @transform_7(%arg0: i32) -> (i32, i32) {
    %c0_i32 = arith.constant 0 : i32
    %c0_i32_0 = arith.constant 0 : i32
    return %arg0, %c0_i32 : i32, i32
  }
}

</mosaic_0001>

<bundles_post_ra>
// kernel: tpu_custom_call.1
= control target key start
LH: loop header
LB: loop body
LE: loop exit
PB: predicated region body
PF: predicated region fallthrough
CT: control target
= control target key end

     0   :  { %12 = vsyncpa [#allocation3], 0  ;;  %s707_s0 = inlined_call_operand.hbm [shape: f32[8,64], index: 0, kind: input, shape index: {}]   ;;  %s708_s1 = inlined_call_operand.hbm [shape: bf16[64,64], index: 1, kind: input, shape index: {}]   ;;  %s709_s2 = inlined_call_operand.vmem [shape: f32[1,64], index: 2, kind: input, shape index: {}]   ;;  %s710_s3 = inlined_call_operand.hbm [shape: bf16[64,64], index: 3, kind: input, shape index: {}]   ;;  %s711_s4 = inlined_call_operand.vmem [shape: f32[1,64], index: 4, kind: input, shape index: {}]   ;;  %s712_s5 = inlined_call_operand.hbm [shape: bf16[64,128], index: 5, kind: input, shape index: {}]   ;;  %s713_s6 = inlined_call_operand.vmem [shape: f32[1,128], index: 6, kind: input, shape index: {}]   ;;  %s714_s7 = inlined_call_operand.hbm [shape: bf16[8,128], index: 7, kind: output, shape index: {}]  }
   0x1   :  { %13 = vsyncpa [#allocation6], 0 }
   0x2   :  { %14 = vsyncpa [#allocation9], 0 }
   0x3   :  { %15 = vsyncpa [#allocation4], 0  ;;  %s574_s24 = smov [#allocation5]   ;;  %s456_s28 = scalar_lea.hbm %s708_s1, 512 }
   0x4   :  { %s31_s25 = sshll.u32 %s574_s24, 4  ;;  %p457_p0 = scmp.ne.s32.totalorder %s708_s1, %s456_s28  ;;  %s32_s25 = int_to_ptr.vmem [resolvable:$true] %s31_s25 }
   0x5   :  { %p460_p1 = scmp.lt.u32.totalorder %s456_s28, %s708_s1 }
   0x7   :  { %p462_p2 = pnand %p460_p1, %p457_p0 }
   0x9   :  { %465 = shalt.err (!%p462_p2)
}
   0xa   :  { %s466_s10 = scalar_lea.vmem %s32_s25, 512  ;;  %p471_p4 = scmp.lt.s32.totalorder %s32_s25, %s32_s25 }
   0xb   :  { %p467_p3 = scmp.ne.s32.totalorder %s32_s25, %s466_s10  ;;  %p472_p5 = scmp.lt.s32.totalorder %s466_s10, %s466_s10 }
   0xd   :  { %p473_p6 = por %p472_p5, %p471_p4 }
   0xf   :  { %p474_p7 = pnand %p473_p6, %p467_p3 }
  0x11   :  { %477 = shalt.err (!%p474_p7)
}
  0x12   :  { %s575_s11 = smov 64   ;;  %s576_s12 = smov 4  }
  0x13   :  { %37 = dma.hbm_to_vmem [thread:$0]  %s708_s1, 512, %s32_s25, [#allocation6], %s575_s11, %s575_s11, %s576_s12  }
  0x14   :  { %s577_s15 = smov [#allocation2]   ;;  %s578_s17 = smov [#allocation7]  }
  0x15   :  { %s22_s16 = sshll.u32 %s577_s15, 4  ;;  %s45_s18 = sshll.u32 %s578_s17, 4  ;;  %s23_s16 = int_to_ptr.vmem [resolvable:$true] %s22_s16  ;;  %s46_s18 = int_to_ptr.vmem [resolvable:$true] %s45_s18 }
  0x16   :  { %s478_s21 = scalar_lea.hbm %s707_s0, 128 }
  0x17   :  { %p479_p8 = scmp.ne.s32.totalorder %s707_s0, %s478_s21  ;;  %p482_p9 = scmp.lt.u32.totalorder %s478_s21, %s707_s0 }
  0x19   :  { %p484_p10 = pnand %p482_p9, %p479_p8 }
  0x1b   :  { %487 = shalt.err (!%p484_p10)
}
  0x1c   :  { %s488_s1 = scalar_lea.vmem %s23_s16, 128  ;;  %p493_p12 = scmp.lt.s32.totalorder %s23_s16, %s23_s16 }
  0x1d   :  { %p489_p11 = scmp.ne.s32.totalorder %s23_s16, %s488_s1  ;;  %p494_p13 = scmp.lt.s32.totalorder %s488_s1, %s488_s1 }
  0x1f   :  { %p495_p0 = por %p494_p13, %p493_p12 }
  0x21   :  { %p496_p1 = pnand %p495_p0, %p489_p11 }
  0x23   :  { %499 = shalt.err (!%p496_p1)
}
  0x24   :  { %25 = dma.hbm_to_vmem [thread:$0]  %s707_s0, 128, %s23_s16, [#allocation3]  }
  0x25   :  { %s500_s30 = scalar_lea.hbm %s710_s3, 512 }
  0x26   :  { %p501_p2 = scmp.ne.s32.totalorder %s710_s3, %s500_s30  ;;  %p504_p3 = scmp.lt.u32.totalorder %s500_s30, %s710_s3 }
  0x28   :  { %p506_p4 = pnand %p504_p3, %p501_p2 }
  0x2a   :  { %509 = shalt.err (!%p506_p4)
}
  0x2b   :  { %s510_s14 = scalar_lea.vmem %s46_s18, 512  ;;  %p515_p6 = scmp.lt.s32.totalorder %s46_s18, %s46_s18 }
  0x2c   :  { %p511_p5 = scmp.ne.s32.totalorder %s46_s18, %s510_s14  ;;  %p516_p7 = scmp.lt.s32.totalorder %s510_s14, %s510_s14 }
  0x2e   :  { %p517_p8 = por %p516_p7, %p515_p6 }
  0x30   :  { %p518_p9 = pnand %p517_p8, %p511_p5 }
  0x32   :  { %521 = shalt.err (!%p518_p9)
}
  0x33   :  { %51 = dma.hbm_to_vmem [thread:$0]  %s710_s3, 512, %s46_s18, [#allocation6], %s575_s11, %s575_s11, %s576_s12  }
  0x34   :  { %s579_s16 = smov [#allocation8]   ;;  %s522_s21 = scalar_lea.hbm %s712_s5, 512 }
  0x35   :  { %s59_s17 = sshll.u32 %s579_s16, 4  ;;  %p523_p10 = scmp.ne.s32.totalorder %s712_s5, %s522_s21  ;;  %s60_s17 = int_to_ptr.vmem [resolvable:$true] %s59_s17 }
  0x36   :  { %p526_p11 = scmp.lt.u32.totalorder %s522_s21, %s712_s5 }
  0x38   :  { %p528_p12 = pnand %p526_p11, %p523_p10 }
  0x3a   :  { %531 = shalt.err (!%p528_p12)
}
  0x3b   :  { %s532_s1 = scalar_lea.vmem %s60_s17, 512  ;;  %p537_p0 = scmp.lt.s32.totalorder %s60_s17, %s60_s17 }
  0x3c   :  { %p533_p13 = scmp.ne.s32.totalorder %s60_s17, %s532_s1  ;;  %p538_p1 = scmp.lt.s32.totalorder %s532_s1, %s532_s1 }
  0x3e   :  { %p539_p2 = por %p538_p1, %p537_p0 }
  0x40   :  { %p540_p3 = pnand %p539_p2, %p533_p13 }
  0x42   :  { %543 = shalt.err (!%p540_p3)
}
  0x43   :  { %65 = dma.hbm_to_vmem [thread:$0]  %s712_s5, 512, %s60_s17, [#allocation9], %s575_s11, %s575_s11, %s576_s12  }
  0x44   :  { %566 = dma.done.wait [#allocation3], 128  }
  0x45   :  { %567 = vsyncadd [#allocation3], 4294967168 }
  0x46   :  { %568 = dma.done.wait [#allocation6], 1024  }
  0x47   :  { %569 = vsyncadd [#allocation6], 4294966272 }
  0x48   :  { %570 = dma.done.wait [#allocation9], 512  }
  0x49   :  { %571 = vsyncadd [#allocation9], 4294966784  ;;  %v580_v0 = vmov 0.0   ;;  %vm581_vm0 = vmmov 0   ;;  %v440_v1 = vld [vmem:[#allocation5] sm:$0xff]   ;;  %v441_v2 = vld [vmem:[#allocation5 + $0x8] sm:$0xff]  }
  0x4a   :  { %395 = vmatprep.subr.bf16.mxu0 %v580_v0  ;;  %403 = vmatprep.mubr.msk.bf16.mxu0 %vm581_vm0, %v580_v0  ;;  %v444_v3 = vld [vmem:[#allocation7] sm:$0xff]   ;;  %v442_v4 = vld [vmem:[#allocation5 + $0x10] sm:$0xff]   ;;  %v445_v5 = vld [vmem:[#allocation7 + $0x8] sm:$0xff]   ;;  %vm122_vm1 = vcmask 523264  }
  0x4b   :  { %407 = vmatprep.subr.bf16.mxu1 %v580_v0  ;;  %415 = vmatprep.mubr.msk.bf16.mxu1 %vm581_vm0, %v580_v0  ;;  %v443_v6 = vld [vmem:[#allocation5 + $0x18] sm:$0xff]   ;;  %v446_v9 = vld [vmem:[#allocation7 + $0x10] sm:$0xff]   ;;  %v448_v11 = vld [vmem:[#allocation8] sm:$0xff]  }
  0x4c   :  { %396 = vmatpush3.bf16.msra.mxu0 %v440_v1  ;;  %408 = vmatpush3.bf16.msra.mxu1 %v444_v3  ;;  %v81_v7 = vld [vmem:[#allocation2] sm:$0xff]  ;;  %v449_v12 = vld [vmem:[#allocation8 + $0x8] sm:$0xff]   ;;  %v450_v21 = vld [vmem:[#allocation8 + $0x10] sm:$0xff]  }
  0x4d   :  { %397 = vmatprep.subr.bf16.mxu0 %v580_v0  ;;  %409 = vmatprep.subr.bf16.mxu1 %v580_v0  ;;  %v82_v8 = vpack.c.bf16 %v81_v7, %v81_v7  ;;  %v447_v10 = vld [vmem:[#allocation7 + $0x18] sm:$0xff]  }
  0x4e   :  { %v362_v13 = vld [vmem:[%s709_s2] ss:$0 sm:$0xff] }
  0x4f   :  { %v451_v22 = vld [vmem:[#allocation8 + $0x18] sm:$0xff]  }
  0x50   :  { %398 = vmatpush3.bf16.msra.mxu0 %v441_v2  ;;  %410 = vmatpush3.bf16.msra.mxu1 %v445_v5  ;;  %v368_v23 = vld [vmem:[%s711_s4] ss:$0 sm:$0xff]  ;;  %s582_s4 = smov [#allocation10]  }
  0x51   :  { %399 = vmatprep.subr.bf16.mxu0 %v580_v0  ;;  %411 = vmatprep.subr.bf16.mxu1 %v580_v0  ;;  %v374_v31 = vld [vmem:[%s713_s6] ss:$0 sm:$0xff]  ;;  %s351_s28 = sshll.u32 %s582_s4, 4  ;;  %s352_s28 = int_to_ptr.vmem [resolvable:$true] %s351_s28 }
  0x52   :  { %s544_s6 = scalar_lea.vmem %s352_s28, 64  ;;  %p549_p5 = scmp.lt.s32.totalorder %s352_s28, %s352_s28 }
  0x53   :  { %p545_p4 = scmp.ne.s32.totalorder %s352_s28, %s544_s6  ;;  %p550_p6 = scmp.lt.s32.totalorder %s544_s6, %s544_s6 }
  0x54   :  { %400 = vmatpush3.bf16.msra.mxu0 %v442_v4  ;;  %412 = vmatpush3.bf16.msra.mxu1 %v446_v9 }
  0x55   :  { %401 = vmatprep.subr.bf16.mxu0 %v580_v0  ;;  %413 = vmatprep.subr.bf16.mxu1 %v580_v0  ;;  %p551_p7 = por %p550_p6, %p549_p5 }
  0x57   :  { %p552_p8 = pnand %p551_p7, %p545_p4 }
  0x58   :  { %402 = vmatpush3.bf16.msra.mxu0 %v443_v6  ;;  %414 = vmatpush3.bf16.msra.mxu1 %v447_v10 }
  0x59   :  { %419 = vmatprep.subr.bf16.mxu0 %v580_v0 }
  0x5b   :  { %404 = vmatmul.mubr.msk.bf16.vlgmr.msra.gmra.mrb[0].mxu0 %vm122_vm1, %v82_v8 }
  0x5c   :  { %427 = vmatprep.mubr.msk.bf16.mxu0 %vm581_vm0, %v580_v0  ;;  %420 = vmatpush3.bf16.msra.mxu0 %v448_v11 }
  0x5d   :  { %421 = vmatprep.subr.bf16.mxu0 %v580_v0 }
  0x60   :  { %422 = vmatpush3.bf16.msra.mxu0 %v449_v12 }
  0x61   :  { %423 = vmatprep.subr.bf16.mxu0 %v580_v0 }
  0x64   :  { %424 = vmatpush3.bf16.msra.mxu0 %v450_v21 }
  0x65   :  { %425 = vmatprep.subr.bf16.mxu0 %v580_v0 }
  0x68   :  { %426 = vmatpush3.bf16.msra.mxu0 %v451_v22 }
 0x12e   :  { %v160_v14 = vpop.f32.mrb[0].mxu0 }
 0x12f   :  { %v161_v15 = vadd.f32 %v362_v13, %v160_v14  ;;  %v405_v16 = vpop.f32.mrb[1].mxu0 }
 0x130   :  { %v163_v17 = vpop.f32.mrb[2].mxu0 }
 0x131   :  { %v166_v18 = vmax.f32 %v161_v15, 0.0  ;;  %v406_v19 = vpop.f32.mrb[3].mxu0 }
 0x133   :  { %v167_v20 = vpack.c.bf16 %v166_v18, %v166_v18 }
 0x135   :  { %416 = vmatmul.mubr.msk.bf16.vlgmr.msra.gmra.mrb[0].mxu1 %vm122_vm1, %v167_v20 }
 0x208   :  { %v244_v24 = vpop.f32.mrb[0].mxu1 }
 0x209   :  { %v245_v25 = vadd.f32 %v368_v23, %v244_v24  ;;  %v417_v26 = vpop.f32.mrb[1].mxu1 }
 0x20a   :  { %v247_v27 = vpop.f32.mrb[2].mxu1 }
 0x20b   :  { %v250_v28 = vmax.f32 %v245_v25, 0.0  ;;  %v418_v29 = vpop.f32.mrb[3].mxu1 }
 0x20d   :  { %v251_v30 = vpack.c.bf16 %v250_v28, %v250_v28 }
 0x20f   :  { %428 = vmatmul.mubr.msk.bf16.vlgmr.msra.gmra.mrb[4].mxu0 %vm122_vm1, %v251_v30 }
 0x2e2   :  { %v328_v32 = vpop.f32.mrb[4].mxu0 }
 0x2e3   :  { %v329_v33 = vadd.f32 %v374_v31, %v328_v32  ;;  %v429_v34 = vpop.f32.mrb[5].mxu0 }
 0x2e4   :  { %v331_v35 = vpop.f32.mrb[6].mxu0 }
 0x2e5   :  { %334 = vmax.xlane.f32.xlu0 %v329_v33  ;;  %v430_v36 = vpop.f32.mrb[7].mxu0 }
 0x372   :  { %v335_v37 = vpop.xlane.xlu0 %334 }
 0x373   :  { %v336_v38 = vsub.f32 %v329_v33, %v335_v37 }
 0x375   :  { %v337_v39 = vmul.f32 1.442695, %v336_v38 }
 0x377   :  { %452 = vpow2.f32 %v337_v39 }
 0x381   :  { %v453_v40 = vpop.eup %452 }
 0x382   :  { %339 = vadd.xlane.f32.xlu0 %v453_v40 }
 0x40f   :  { %v340_v41 = vpop.xlane.xlu0 %339 }
 0x410   :  { %454 = vrcp.f32 %v340_v41 }
 0x41a   :  { %v455_v42 = vpop.eup %454 }
 0x41b   :  { %v342_v43 = vmul.f32 %v455_v42, %v453_v40 }
 0x41d   :  { %v343_v44 = vpack.c.bf16 %v342_v43, %v342_v43 }
 0x41f   :  { %344 = vst [vmem:[#allocation10] sm:$0xf] %v343_v44 }
 0x420   :  { %555 = shalt.err (!%p552_p8)
}
 0x421   :  { %s556_s8 = scalar_lea.hbm %s714_s7, 64 }
 0x422   :  { %p557_p9 = scmp.ne.s32.totalorder %s714_s7, %s556_s8  ;;  %p560_p10 = scmp.lt.u32.totalorder %s556_s8, %s714_s7 }
 0x424   :  { %p562_p11 = pnand %p560_p10, %p557_p9 }
 0x426   :  { %565 = shalt.err (!%p562_p11)
}
 0x427   :  { %354 = dma.vmem_to_hbm [thread:$0]  %s352_s28, 64, %s714_s7, [#allocation4]  }
 0x428   :  { %572 = dma.done.wait [#allocation4], 64  }
 0x429   :  { %573 = vsyncadd [#allocation4], 4294967232 }
 0x42a   :  { %358 = vsyncpa [#allocation3], 1 }
 0x42b   :  { %359 = vsyncpa [#allocation6], 1 }
 0x42c   :  { %360 = vsyncpa [#allocation9], 1 }
 0x42d   :  { %361 = vsyncpa [#allocation4], 1 }

</bundles_post_ra>
